<compile_context>
chip_gen: v7x
topology: tpu7x:2x2x1
jax: 0.10.0
libtpu: 0.0.40
codegen_flags: <defaults>
</compile_context>

<pallas_src>
import jax
import jax.numpy as jnp
from jax.experimental import pallas as pl
from jax.experimental.pallas import tpu as pltpu

BN_EPS = 1e-5


def _make_fd_kernel(n_stages: int, n_input: int):
    """Kernel ref order:
       x, W_0 .. W_{n_stages-1}, gb_packed, Wout_pad, bout_pad, out
    All refs are full-array VMEM tiles (problem is tiny; no grid needed)."""

    def kernel(*refs):
        x_ref = refs[0]
        w_refs = refs[1:1 + n_stages]
        gb_ref = refs[1 + n_stages]        # (2*n_stages, hidden): rows [g0, b0, g1, b1, ...]
        wout_ref = refs[2 + n_stages]      # (hidden, n_out_pad)   (zero-padded columns)
        bout_ref = refs[3 + n_stages]      # (1, n_out_pad)
        out_ref = refs[4 + n_stages]       # (B, n_out_pad)        lane-dense output

        h = x_ref[...]                     # (B, n_input), f32
        inv_n = 1.0 / h.shape[0]

        for s in range(n_stages):
            w = w_refs[s][...]
            if s == 0 and n_input == 1:
                # K=1 matmul == outer product: keep it on the VPU, skip MXU push/pop.
                h = h * w                                      # (B,1)*(1,H) -> (B,H)
            else:
                h = jnp.dot(h, w, preferred_element_type=jnp.float32)

            # BatchNorm1d (training mode), one-pass stats, folded into scale/shift.
            # (The Linear bias is omitted upstream: it cancels exactly in h - mean.)
            mean = jnp.sum(h, axis=0, keepdims=True) * inv_n
            ex2 = jnp.sum(h * h, axis=0, keepdims=True) * inv_n
            var = jnp.maximum(ex2 - mean * mean, 0.0)
            g = gb_ref[pl.ds(2 * s, 1), :]                     # (1, H)
            be = gb_ref[pl.ds(2 * s + 1, 1), :]                # (1, H)
            scale = g * jax.lax.rsqrt(var + BN_EPS)            # rsqrt -> EUP slot
            shift = be - mean * scale
            # fused BN + ReLU: two VPU broadcasts over h instead of four
            h = jnp.maximum(h * scale + shift, 0.0)

        # Output projection, padded to >=128 lanes -> unmasked stores.
        out_ref[...] = (
            jnp.dot(h, wout_ref[...], preferred_element_type=jnp.float32) + bout_ref[...]
        )

    return kernel


def fd_learner_forward(x, stage_params, wout, bout):
    """x: (B, n_input) f32.
    stage_params: list of (W, b, gamma, beta) with W:(in,hidden), b/gamma/beta:(hidden,).
    (b is accepted for interface parity with PyTorch but is not used: it cancels in BN.)
    wout: (hidden, n_out), bout: (n_out,)."""
    n_stages = len(stage_params)
    n_input = x.shape[1]
    n_hidden = stage_params[0][0].shape[1]
    B = x.shape[0]
    n_out = wout.shape[1]
    n_out_pad = ((n_out + 127) // 128) * 128

    # Pack per-stage gamma/beta into a single small array (one DMA instead of 2*n_stages).
    gb = jnp.concatenate(
        [jnp.stack([g, be], axis=0) for (_w, _b, g, be) in stage_params], axis=0
    )  # (2*n_stages, hidden)

    # Lane-dense padded output projection parameters.
    wout_pad = jnp.pad(wout, ((0, 0), (0, n_out_pad - n_out)))
    bout_pad = jnp.pad(bout.reshape(1, -1), ((0, 0), (0, n_out_pad - n_out)))

    args = [x] + [w for (w, _b, _g, _be) in stage_params] + [gb, wout_pad, bout_pad]

    vmem_spec = pl.BlockSpec(memory_space=pltpu.MemorySpace.VMEM)
    out_pad = pl.pallas_call(
        _make_fd_kernel(n_stages, n_input),
        out_shape=jax.ShapeDtypeStruct((B, n_out_pad), jnp.float32),
        in_specs=[vmem_spec] * len(args),
        out_specs=vmem_spec,
    )(*args)
    return out_pad[:, :n_out]


def _init_params(key, n_input, n_hidden, n_output, n_used_layers):
    """Deterministic init mirroring PyTorch Linear's U(-1/sqrt(fan_in), 1/sqrt(fan_in));
    BatchNorm affine params start at gamma=1, beta=0."""
    stage_params = []
    fan_ins = [n_input] + [n_hidden] * (n_used_layers - 1)
    for fan_in in fan_ins:
        key, kw, kb = jax.random.split(key, 3)
        bound = 1.0 / (fan_in ** 0.5)
        w = jax.random.uniform(kw, (fan_in, n_hidden), jnp.float32, -bound, bound)
        b = jax.random.uniform(kb, (n_hidden,), jnp.float32, -bound, bound)
        g = jnp.ones((n_hidden,), jnp.float32)
        be = jnp.zeros((n_hidden,), jnp.float32)
        stage_params.append((w, b, g, be))
    key, kw, kb = jax.random.split(key, 3)
    bound = 1.0 / (n_hidden ** 0.5)
    wout = jax.random.uniform(kw, (n_hidden, n_output), jnp.float32, -bound, bound)
    bout = jax.random.uniform(kb, (n_output,), jnp.float32, -bound, bound)
    return stage_params, wout, bout


def _reference_forward(x, stage_params, wout, bout):
    """Pure-JAX reference faithful to the PyTorch module (bias kept, two-pass BN stats)."""
    h = x
    for (w, b, g, be) in stage_params:
        h = h @ w + b
        mean = jnp.mean(h, axis=0, keepdims=True)
        var = jnp.mean((h - mean) ** 2, axis=0, keepdims=True)
        h = (h - mean) * jax.lax.rsqrt(var + BN_EPS) * g + be
        h = jnp.maximum(h, 0.0)
    return h @ wout + bout


if __name__ == "__main__":
    # Module defaults: n_input=1, n_output=1, n_layer=2 -> forward uses 2 hidden stages.
    n_input, n_output, n_layer, n_hidden = 1, 1, 2, 32
    n_used_layers = n_layer  # len(self.layers[:-1]) == n_layer for this construction
    batch = 8

    key = jax.random.PRNGKey(0)
    key, kx = jax.random.split(key)
    x = jax.random.normal(kx, (batch, n_input), jnp.float32)

    stage_params, wout, bout = _init_params(key, n_input, n_hidden, n_output, n_used_layers)

    fwd = jax.jit(fd_learner_forward)
    out = fwd(x, stage_params, wout, bout)
    out = jax.block_until_ready(out)

    ref = _reference_forward(x, stage_params, wout, bout)
    assert out.shape == (batch, n_output)
    assert jnp.allclose(out, ref, atol=1e-4, rtol=1e-4), "mismatch vs pure-JAX reference"

    print("KERNEL_OK")
</pallas_src>

<mosaic_0001>
module attributes {stable_mosaic.version = 11 : i64} {
  func.func @kernel(%arg0: memref<8x1xf32, #tpu.memory_space<vmem>>, %arg1: memref<1x32xf32, #tpu.memory_space<vmem>>, %arg2: memref<32x32xf32, #tpu.memory_space<vmem>>, %arg3: memref<4x32xf32, #tpu.memory_space<vmem>>, %arg4: memref<32x128xf32, #tpu.memory_space<vmem>>, %arg5: memref<1x128xf32, #tpu.memory_space<vmem>>, %arg6: memref<8x128xf32, #tpu.memory_space<vmem>>) attributes {dimension_semantics = [], scalar_prefetch = 0 : i64, scratch_operands = 0 : i64, tpu.core_type = #tpu.core_type<tc>} {
    %c0 = arith.constant 0 : index
    %c0_0 = arith.constant 0 : index
    %0 = vector.load %arg0[%c0, %c0_0] : memref<8x1xf32, #tpu.memory_space<vmem>>, vector<8x1xf32>
    %c0_1 = arith.constant 0 : index
    %c0_2 = arith.constant 0 : index
    %1 = vector.load %arg1[%c0_1, %c0_2] : memref<1x32xf32, #tpu.memory_space<vmem>>, vector<1x32xf32>
    %2 = vector.broadcast %0 : vector<8x1xf32> to vector<8x32xf32>
    %3 = vector.broadcast %1 : vector<1x32xf32> to vector<8x32xf32>
    %4 = arith.mulf %2, %3 : vector<8x32xf32>
    %cst = arith.constant dense<0.000000e+00> : vector<32xf32>
    %5 = vector.multi_reduction <add>, %4, %cst [0] : vector<8x32xf32> to vector<32xf32>
    %6 = vector.shape_cast %5 : vector<32xf32> to vector<1x32xf32>
    %cst_3 = arith.constant 1.250000e-01 : f32
    %7 = vector.broadcast %cst_3 : f32 to vector<1x32xf32>
    %8 = arith.mulf %6, %7 : vector<1x32xf32>
    %9 = arith.mulf %4, %4 : vector<8x32xf32>
    %cst_4 = arith.constant dense<0.000000e+00> : vector<32xf32>
    %10 = vector.multi_reduction <add>, %9, %cst_4 [0] : vector<8x32xf32> to vector<32xf32>
    %11 = vector.shape_cast %10 : vector<32xf32> to vector<1x32xf32>
    %cst_5 = arith.constant 1.250000e-01 : f32
    %12 = vector.broadcast %cst_5 : f32 to vector<1x32xf32>
    %13 = arith.mulf %11, %12 : vector<1x32xf32>
    %14 = arith.mulf %8, %8 : vector<1x32xf32>
    %15 = arith.subf %13, %14 : vector<1x32xf32>
    %cst_6 = arith.constant 0.000000e+00 : f32
    %16 = vector.broadcast %cst_6 : f32 to vector<1x32xf32>
    %17 = arith.maximumf %15, %16 : vector<1x32xf32>
    %c0_7 = arith.constant 0 : index
    %c0_8 = arith.constant 0 : index
    %18 = vector.load %arg3[%c0_7, %c0_8] : memref<4x32xf32, #tpu.memory_space<vmem>>, vector<1x32xf32>
    %c1 = arith.constant 1 : index
    %c0_9 = arith.constant 0 : index
    %19 = vector.load %arg3[%c1, %c0_9] : memref<4x32xf32, #tpu.memory_space<vmem>>, vector<1x32xf32>
    %cst_10 = arith.constant 9.99999974E-6 : f32
    %20 = vector.broadcast %cst_10 : f32 to vector<1x32xf32>
    %21 = arith.addf %17, %20 : vector<1x32xf32>
    %22 = math.rsqrt %21 : vector<1x32xf32>
    %23 = arith.mulf %18, %22 : vector<1x32xf32>
    %24 = arith.mulf %8, %23 : vector<1x32xf32>
    %25 = arith.subf %19, %24 : vector<1x32xf32>
    %26 = vector.broadcast %23 : vector<1x32xf32> to vector<8x32xf32>
    %27 = arith.mulf %4, %26 : vector<8x32xf32>
    %28 = vector.broadcast %25 : vector<1x32xf32> to vector<8x32xf32>
    %29 = arith.addf %27, %28 : vector<8x32xf32>
    %cst_11 = arith.constant 0.000000e+00 : f32
    %30 = vector.broadcast %cst_11 : f32 to vector<8x32xf32>
    %31 = arith.maximumf %29, %30 : vector<8x32xf32>
    %c0_12 = arith.constant 0 : index
    %c0_13 = arith.constant 0 : index
    %32 = vector.load %arg2[%c0_12, %c0_13] : memref<32x32xf32, #tpu.memory_space<vmem>>, vector<32x32xf32>
    %cst_14 = arith.constant dense<0.000000e+00> : vector<8x32xf32>
    %33 = tpu.matmul %31, %32, %cst_14 {dimension_numbers = #tpu.dot_dimension_numbers<[1], [0], [0], [1], [0, 0, 1, 1], [], []>} : vector<8x32xf32>, vector<32x32xf32>, vector<8x32xf32> -> vector<8x32xf32>
    %cst_15 = arith.constant dense<0.000000e+00> : vector<32xf32>
    %34 = vector.multi_reduction <add>, %33, %cst_15 [0] : vector<8x32xf32> to vector<32xf32>
    %35 = vector.shape_cast %34 : vector<32xf32> to vector<1x32xf32>
    %cst_16 = arith.constant 1.250000e-01 : f32
    %36 = vector.broadcast %cst_16 : f32 to vector<1x32xf32>
    %37 = arith.mulf %35, %36 : vector<1x32xf32>
    %38 = arith.mulf %33, %33 : vector<8x32xf32>
    %cst_17 = arith.constant dense<0.000000e+00> : vector<32xf32>
    %39 = vector.multi_reduction <add>, %38, %cst_17 [0] : vector<8x32xf32> to vector<32xf32>
    %40 = vector.shape_cast %39 : vector<32xf32> to vector<1x32xf32>
    %cst_18 = arith.constant 1.250000e-01 : f32
    %41 = vector.broadcast %cst_18 : f32 to vector<1x32xf32>
    %42 = arith.mulf %40, %41 : vector<1x32xf32>
    %43 = arith.mulf %37, %37 : vector<1x32xf32>
    %44 = arith.subf %42, %43 : vector<1x32xf32>
    %cst_19 = arith.constant 0.000000e+00 : f32
    %45 = vector.broadcast %cst_19 : f32 to vector<1x32xf32>
    %46 = arith.maximumf %44, %45 : vector<1x32xf32>
    %c2 = arith.constant 2 : index
    %c0_20 = arith.constant 0 : index
    %47 = vector.load %arg3[%c2, %c0_20] : memref<4x32xf32, #tpu.memory_space<vmem>>, vector<1x32xf32>
    %c3 = arith.constant 3 : index
    %c0_21 = arith.constant 0 : index
    %48 = vector.load %arg3[%c3, %c0_21] : memref<4x32xf32, #tpu.memory_space<vmem>>, vector<1x32xf32>
    %cst_22 = arith.constant 9.99999974E-6 : f32
    %49 = vector.broadcast %cst_22 : f32 to vector<1x32xf32>
    %50 = arith.addf %46, %49 : vector<1x32xf32>
    %51 = math.rsqrt %50 : vector<1x32xf32>
    %52 = arith.mulf %47, %51 : vector<1x32xf32>
    %53 = arith.mulf %37, %52 : vector<1x32xf32>
    %54 = arith.subf %48, %53 : vector<1x32xf32>
    %55 = vector.broadcast %52 : vector<1x32xf32> to vector<8x32xf32>
    %56 = arith.mulf %33, %55 : vector<8x32xf32>
    %57 = vector.broadcast %54 : vector<1x32xf32> to vector<8x32xf32>
    %58 = arith.addf %56, %57 : vector<8x32xf32>
    %cst_23 = arith.constant 0.000000e+00 : f32
    %59 = vector.broadcast %cst_23 : f32 to vector<8x32xf32>
    %60 = arith.maximumf %58, %59 : vector<8x32xf32>
    %c0_24 = arith.constant 0 : index
    %c0_25 = arith.constant 0 : index
    %61 = vector.load %arg4[%c0_24, %c0_25] : memref<32x128xf32, #tpu.memory_space<vmem>>, vector<32x128xf32>
    %cst_26 = arith.constant dense<0.000000e+00> : vector<8x128xf32>
    %62 = tpu.matmul %60, %61, %cst_26 {dimension_numbers = #tpu.dot_dimension_numbers<[1], [0], [0], [1], [0, 0, 1, 1], [], []>} : vector<8x32xf32>, vector<32x128xf32>, vector<8x128xf32> -> vector<8x128xf32>
    %c0_27 = arith.constant 0 : index
    %c0_28 = arith.constant 0 : index
    %63 = vector.load %arg5[%c0_27, %c0_28] : memref<1x128xf32, #tpu.memory_space<vmem>>, vector<1x128xf32>
    %64 = vector.broadcast %63 : vector<1x128xf32> to vector<8x128xf32>
    %65 = arith.addf %62, %64 : vector<8x128xf32>
    %c0_29 = arith.constant 0 : index
    %c0_30 = arith.constant 0 : index
    %66 = vector.load %arg6[%c0_29, %c0_30] : memref<8x128xf32, #tpu.memory_space<vmem>>, vector<8x128xf32>
    tpu.vector_store %arg6[%c0_29, %c0_30], %65 {strides = array<i32>} : memref<8x128xf32, #tpu.memory_space<vmem>>, vector<8x128xf32>,
    return
  }
}

</mosaic_0001>

<bundles_post_ra>
// kernel: fd_learner_forward.1
= control target key start
LH: loop header
LB: loop body
LE: loop exit
PB: predicated region body
PF: predicated region fallthrough
CT: control target
= control target key end

     0   :  { %v337_v0 = vmov 0   ;;  %v338_v5 = vmov 0.0|0.0   ;;  %vm339_vm0 = vmmov 0   ;;  %v340_v9 = vmov 0.0   ;;  %s430_s0 = inlined_call_operand.vmem [shape: f32[8,1], index: 0, kind: input, shape index: {}]   ;;  %s431_s2 = inlined_call_operand.vmem [shape: f32[32,32], index: 2, kind: input, shape index: {}]   ;;  %s432_s1 = inlined_call_operand.vmem [shape: f32[1,32], index: 1, kind: input, shape index: {}]   ;;  %s433_s3 = inlined_call_operand.vmem [shape: f32[4,32], index: 3, kind: input, shape index: {}]   ;;  %s434_s4 = inlined_call_operand.vmem [shape: f32[32,128], index: 4, kind: input, shape index: {}]   ;;  %s435_s5 = inlined_call_operand.vmem [shape: f32[1,128], index: 5, kind: input, shape index: {}]   ;;  %s436_s6 = inlined_call_operand.vmem [shape: f32[8,128], index: 6, kind: output, shape index: {}]  }
   0x1   :  { %332 = vset.pattern.permute.xlu0 %v337_v0  ;;  %v23_v1 = vld [vmem:[%s430_s0] sm:$0xff]  ;;  %v77_v3 = vld [vmem:[%s431_s2 + $0x8] sm:$0xff]  ;;  %316 = vmatprep.subr.bf16.mxu0 %v338_v5  ;;  %v78_v6 = vld [vmem:[%s431_s2 + $0x10] sm:$0xff]  ;;  %vm37_vm1 = vcmask 261120   ;;  %v65_v34 = vlaneseq }
   0x2   :  { %27 = vperm.xlu0 %332, %v23_v1   ;;  %v76_v2 = vld [vmem:[%s431_s2] sm:$0xff]  ;;  %322 = vmatprep.subr.bf16.mxu1 %v338_v5  ;;  %v79_v7 = vld [vmem:[%s431_s2 + $0x18] sm:$0xff]  ;;  %v192_v49 = vld [vmem:[%s434_s4 + $0x8] sm:$0xff] }
   0x3   :  { %v317_v4 = vpack.c.bf16 %v77_v3, %v76_v2  ;;  %v320_v8 = vpack.c.bf16 %v79_v7, %v78_v6  ;;  %302 = vmatprep.mubr.msk.f32.mxu0 %vm339_vm0, %v340_v9  ;;  %313 = vmatprep.mubr.msk.f32.mxu1 %vm339_vm0, %v340_v9  ;;  %v280_v10 = vld [vmem:[%s432_s1] ss:$0 sm:$0xff]  ;;  %v66_v35 = vshrl.u32 %v65_v34, 7  ;;  %v59_v40 = vld [vmem:[%s433_s3 + $0x1] sm:$0x1]  ;;  %v193_v51 = vld [vmem:[%s434_s4 + $0x10] sm:$0xff] }
   0x4   :  { %v58_v36 = vld [vmem:[%s433_s3] sm:$0x1]  ;;  %v194_v52 = vld [vmem:[%s434_s4 + $0x18] sm:$0xff] }
   0x5   :  { %318 = vmatpush3.bf16.msra.mxu0 %v317_v4  ;;  %v67_v37 = vsub.s32 0, %v66_v35  ;;  %v191_v48 = vld [vmem:[%s434_s4] sm:$0xff]  ;;  %v326_v53 = vpack.c.bf16 %v194_v52, %v193_v51 }
   0x6   :  { %319 = vmatprep.subr.bf16.mxu0 %v338_v5  ;;  %v323_v50 = vpack.c.bf16 %v192_v49, %v191_v48 }
   0x8   :  { %324 = vmatpush3.bf16.msra.mxu1 %v323_v50 }
   0x9   :  { %321 = vmatpush3.bf16.msra.mxu0 %v320_v8  ;;  %325 = vmatprep.subr.bf16.mxu1 %v338_v5 }
   0xc   :  { %327 = vmatpush3.bf16.msra.mxu1 %v326_v53 }
  0x81   :  { %v28_v11 = vpop.permute.xlu0 %27 }
  0x82   :  { %v36_v12 = vmul.f32 %v280_v10, %v28_v11 }
  0x84   :  { %v38_v13 = vsel %vm37_vm1, %v36_v12, 0.0  ;;  %v46_v14 = vmul.f32 %v36_v12, %v36_v12 }
  0x85   :  { %v39_v15 = vrot.slane %v38_v13, 4 }
  0x86   :  { %v47_v16 = vsel %vm37_vm1, %v46_v14, 0.0 }
  0x87   :  { %v40_v17 = vadd.f32 %v39_v15, %v38_v13  ;;  %v48_v18 = vrot.slane %v47_v16, 4  ;;  %v173_v13 = vld [vmem:[%s433_s3 + $0x2] sm:$0x1] }
  0x89   :  { %v41_v19 = vrot.slane %v40_v17, 2  ;;  %v49_v20 = vadd.f32 %v48_v18, %v47_v16  ;;  %v174_v16 = vld [vmem:[%s433_s3 + $0x3] sm:$0x1] }
  0x8b   :  { %v42_v21 = vadd.f32 %v41_v19, %v40_v17  ;;  %v50_v22 = vrot.slane %v49_v20, 2 }
  0x8d   :  { %v43_v23 = vrot.slane %v42_v21, 1  ;;  %v51_v24 = vadd.f32 %v50_v22, %v49_v20 }
  0x8f   :  { %v44_v25 = vadd.f32 %v43_v23, %v42_v21  ;;  %v52_v26 = vrot.slane %v51_v24, 1 }
  0x91   :  { %v45_v27 = vmul.f32 0.125, %v44_v25  ;;  %v53_v28 = vadd.f32 %v52_v26, %v51_v24  ;;  %v282_v24 = vld [vmem:[%s435_s5] ss:$0 sm:$0xff] }
  0x93   :  { %v54_v29 = vmul.f32 0.125, %v53_v28  ;;  %v55_v30 = vmul.f32 %v45_v27, %v45_v27 }
  0x95   :  { %v56_v31 = vsub.f32 %v54_v29, %v55_v30 }
  0x97   :  { %v57_v32 = vmax.f32 %v56_v31, 0.0 }
  0x99   :  { %v60_v33 = vadd.f32 1e-05, %v57_v32 }
  0x9b   :  { %333 = vrsqrt.f32 %v60_v33 }
  0xa5   :  { %v334_v38 = vpop.eup %333 }
  0xa6   :  { %v62_v39 = vmul.f32 %v334_v38, %v58_v36 }
  0xa8   :  { %v63_v41 = vmul.f32 %v62_v39, %v45_v27  ;;  %v68_v42 = vrot.slane %v62_v39, %v67_v37 }
  0xaa   :  { %v64_v43 = vsub.f32 %v59_v40, %v63_v41  ;;  %v69_v44 = vmul.f32 %v68_v42, %v36_v12 }
  0xac   :  { %v73_v45 = vrot.slane %v64_v43, %v67_v37 }
  0xae   :  { %v74_v46 = vadd.f32 %v73_v45, %v69_v44 }
  0xb0   :  { %v75_v47 = vmax.f32 %v74_v46, 0.0 }
  0xb2   :  { %303 = vmatmul.mubr.msk.f32.vlgmr.msra.gmra.mrb[0].mxu0 %vm37_vm1, %v75_v47 }
 0x185   :  { %v149_v54 = vpop.f32.mrb[0].mxu0 }
 0x186   :  { %v153_v55 = vsel %vm37_vm1, %v149_v54, 0.0  ;;  %v161_v56 = vmul.f32 %v149_v54, %v149_v54  ;;  %v304_v57 = vpop.f32.mrb[1].mxu0 }
 0x187   :  { %v154_v58 = vrot.slane %v153_v55, 4 }
 0x188   :  { %v162_v59 = vsel %vm37_vm1, %v161_v56, 0.0 }
 0x189   :  { %v155_v60 = vadd.f32 %v154_v58, %v153_v55  ;;  %v163_v61 = vrot.slane %v162_v59, 4 }
 0x18b   :  { %v156_v62 = vrot.slane %v155_v60, 2  ;;  %v164_v63 = vadd.f32 %v163_v61, %v162_v59 }
 0x18d   :  { %v157_v0 = vadd.f32 %v156_v62, %v155_v60  ;;  %v165_v1 = vrot.slane %v164_v63, 2 }
 0x18f   :  { %v158_v2 = vrot.slane %v157_v0, 1  ;;  %v166_v3 = vadd.f32 %v165_v1, %v164_v63 }
 0x191   :  { %v159_v4 = vadd.f32 %v158_v2, %v157_v0  ;;  %v167_v5 = vrot.slane %v166_v3, 1 }
 0x193   :  { %v160_v6 = vmul.f32 0.125, %v159_v4  ;;  %v168_v7 = vadd.f32 %v167_v5, %v166_v3 }
 0x195   :  { %v169_v8 = vmul.f32 0.125, %v168_v7  ;;  %v170_v9 = vmul.f32 %v160_v6, %v160_v6 }
 0x197   :  { %v171_v10 = vsub.f32 %v169_v8, %v170_v9 }
 0x199   :  { %v172_v11 = vmax.f32 %v171_v10, 0.0 }
 0x19b   :  { %v175_v12 = vadd.f32 1e-05, %v172_v11 }
 0x19d   :  { %335 = vrsqrt.f32 %v175_v12 }
 0x1a7   :  { %v336_v14 = vpop.eup %335 }
 0x1a8   :  { %v177_v15 = vmul.f32 %v336_v14, %v173_v13 }
 0x1aa   :  { %v178_v17 = vmul.f32 %v177_v15, %v160_v6  ;;  %v183_v18 = vrot.slane %v177_v15, %v67_v37 }
 0x1ac   :  { %v179_v19 = vsub.f32 %v174_v16, %v178_v17  ;;  %v184_v20 = vmul.f32 %v183_v18, %v149_v54 }
 0x1ae   :  { %v188_v21 = vrot.slane %v179_v19, %v67_v37 }
 0x1b0   :  { %v189_v22 = vadd.f32 %v188_v21, %v184_v20 }
 0x1b2   :  { %v190_v23 = vmax.f32 %v189_v22, 0.0 }
 0x1b4   :  { %314 = vmatmul.mubr.msk.f32.vlgmr.msra.gmra.mrb[0].mxu1 %vm37_vm1, %v190_v23 }
 0x287   :  { %v271_v25 = vpop.f32.mrb[0].mxu1 }
 0x288   :  { %v272_v26 = vadd.f32 %v282_v24, %v271_v25  ;;  %v315_v27 = vpop.f32.mrb[1].mxu1 }
 0x28a   :  { %275 = vst [vmem:[%s436_s6] sm:$0xff] %v272_v26 }

</bundles_post_ra>
